<compile_context>
chip_gen: v5e
topology: v5e:2x2
jax: 0.10.0
libtpu: 0.0.40
codegen_flags: <defaults>
</compile_context>

<pallas_src>
import functools
import math

import jax
import jax.numpy as jnp
from jax.experimental import pallas as pl
from jax.experimental.pallas import tpu as pltpu

PARAM_DTYPE = jnp.bfloat16   # TPU-native half (reference uses torch.half/fp16)
NEG_FILL = -10000.0          # matches masked_fill(mask == False, -10000.0)
LN_EPS = 1e-5                # torch.nn.LayerNorm default
VMEM_LIMIT = 32 * 1024 * 1024   # safe on v5e/v6e (128 MiB) and v7x (64 MiB)

# Tile targets (256-wide keeps v6e/v7x 2x256x256 MXU full; 128 is enough on v5e).
TM, TN, TK = 256, 256, 512


def _tile(dim, target):
    """Use `target` when it evenly divides `dim`, else fall back to the full dim."""
    return target if dim % target == 0 else dim


# ----------------------------- Pallas kernels ------------------------------ #

def _linear_bias_kernel(x_ref, w_ref, b_ref, o_ref, acc_ref):
    """Tiled y = x @ w + b with f32 VMEM accumulator over the K grid axis."""
    @pl.when(pl.program_id(2) == 0)
    def _init():
        acc_ref[...] = jnp.zeros_like(acc_ref)

    acc_ref[...] += jnp.dot(x_ref[...], w_ref[...],
                            preferred_element_type=jnp.float32)

    @pl.when(pl.program_id(2) == pl.num_programs(2) - 1)
    def _finalize():
        o_ref[...] = (acc_ref[...] + b_ref[...].astype(jnp.float32)
                      ).astype(o_ref.dtype)


def linear(x2d, w, b):
    M, K = x2d.shape
    N = w.shape[1]
    tm, tn, tk = _tile(M, TM), _tile(N, TN), _tile(K, TK)
    return pl.pallas_call(
        _linear_bias_kernel,
        out_shape=jax.ShapeDtypeStruct((M, N), x2d.dtype),
        grid=(M // tm, N // tn, K // tk),
        in_specs=[
            pl.BlockSpec((tm, tk), lambda i, j, k: (i, k)),
            pl.BlockSpec((tk, tn), lambda i, j, k: (k, j)),
            pl.BlockSpec((1, tn), lambda i, j, k: (0, j)),
        ],
        out_specs=pl.BlockSpec((tm, tn), lambda i, j, k: (i, j)),
        scratch_shapes=[pltpu.VMEM((tm, tn), jnp.float32)],
        compiler_params=pltpu.CompilerParams(
            dimension_semantics=("parallel", "parallel", "arbitrary"),
            vmem_limit_bytes=VMEM_LIMIT),
    )(x2d, w, b.reshape(1, N))


def _attention_kernel(qkv_ref, m_ref, o_ref, *, n_heads, dim_head, scale):
    """Per-batch multi-head attention on a (T, 3D) lane-dense QKV slab.

    Causal + padding mask is built in-kernel (VPU iota), scores use the NT
    dot_general path (no explicit transpose), softmax reciprocal on the EUP.
    """
    T = qkv_ref.shape[1]
    D = n_heads * dim_head

    rows = jax.lax.broadcasted_iota(jnp.int32, (T, T), 0)   # query index
    cols = jax.lax.broadcasted_iota(jnp.int32, (T, T), 1)   # key index
    keep = jnp.logical_and(cols <= rows, m_ref[0] != 0)     # (T,T) & (1,T) -> (T,T)

    outs = []
    for h in range(n_heads):                                # static unroll over heads
        lo = h * dim_head
        q = qkv_ref[0, :, lo:lo + dim_head]                 # (T, d) bf16
        k = qkv_ref[0, :, D + lo:D + lo + dim_head]         # (T, d) bf16
        v = qkv_ref[0, :, 2 * D + lo:2 * D + lo + dim_head]  # (T, d) bf16

        # q @ k^T via NT dimension numbers (no XLU transpose), f32 accumulation.
        s = jax.lax.dot_general(q, k, (((1,), (1,)), ((), ())),
                                preferred_element_type=jnp.float32) * scale
        s = jnp.where(keep, s, NEG_FILL)
        s = s - jnp.max(s, axis=-1, keepdims=True)
        p = jnp.exp(s)
        p = p * pl.reciprocal(jnp.sum(p, axis=-1, keepdims=True), approx=True)
        outs.append(jnp.dot(p.astype(q.dtype), v,
                            preferred_element_type=jnp.float32))

    # Head-concatenated, lane-dense (T, D) output block (single full store).
    o_ref[0] = jnp.concatenate(outs, axis=-1).astype(o_ref.dtype)


def multi_head_attention(qkv3, mask_b1t, n_heads, dim_head, scale):
    B, T, threeD = qkv3.shape
    D = n_heads * dim_head
    return pl.pallas_call(
        functools.partial(_attention_kernel, n_heads=n_heads,
                          dim_head=dim_head, scale=scale),
        out_shape=jax.ShapeDtypeStruct((B, T, D), qkv3.dtype),
        grid=(B,),
        in_specs=[
            pl.BlockSpec((1, T, threeD), lambda b: (b, 0, 0)),
            pl.BlockSpec((1, 1, T), lambda b: (b, 0, 0)),
        ],
        out_specs=pl.BlockSpec((1, T, D), lambda b: (b, 0, 0)),
        compiler_params=pltpu.CompilerParams(
            dimension_semantics=("parallel",), vmem_limit_bytes=VMEM_LIMIT),
    )(qkv3, mask_b1t)


def _proj_add_ln_kernel(a_ref, w_ref, b_ref, res_ref, g_ref, beta_ref, o_ref):
    """out = LayerNorm(res + a @ w + b) * gamma + beta  (W_out + SkipNorm)."""
    y = jnp.dot(a_ref[...], w_ref[...], preferred_element_type=jnp.float32)
    y = y + b_ref[...].astype(jnp.float32) + res_ref[...].astype(jnp.float32)
    mu = jnp.mean(y, axis=-1, keepdims=True)
    var = jnp.mean(jnp.square(y - mu), axis=-1, keepdims=True)
    yn = (y - mu) * jax.lax.rsqrt(var + LN_EPS)
    o_ref[...] = (yn * g_ref[...].astype(jnp.float32)
                  + beta_ref[...].astype(jnp.float32)).astype(o_ref.dtype)


def proj_add_layernorm(a2d, w, b, res2d, gamma, beta):
    M, K = a2d.shape
    N = w.shape[1]
    tm = _tile(M, TM)
    return pl.pallas_call(
        _proj_add_ln_kernel,
        out_shape=jax.ShapeDtypeStruct((M, N), res2d.dtype),
        grid=(M // tm,),
        in_specs=[
            pl.BlockSpec((tm, K), lambda i: (i, 0)),
            pl.BlockSpec((K, N), lambda i: (0, 0)),
            pl.BlockSpec((1, N), lambda i: (0, 0)),
            pl.BlockSpec((tm, N), lambda i: (i, 0)),
            pl.BlockSpec((1, N), lambda i: (0, 0)),
            pl.BlockSpec((1, N), lambda i: (0, 0)),
        ],
        out_specs=pl.BlockSpec((tm, N), lambda i: (i, 0)),
        compiler_params=pltpu.CompilerParams(
            dimension_semantics=("parallel",), vmem_limit_bytes=VMEM_LIMIT),
    )(a2d, w, b.reshape(1, N), res2d, gamma.reshape(1, N), beta.reshape(1, N))


def _ffn_add_ln_kernel(x_ref, w1_ref, b1_ref, w2_ref, b2_ref, g_ref, beta_ref,
                       o_ref):
    """out = LayerNorm(x + GELU(x @ w1 + b1) @ w2 + b2) * gamma + beta.

    The (tm, dim_ff) hidden activation stays in VMEM (never hits HBM).
    """
    x = x_ref[...]
    h = jnp.dot(x, w1_ref[...], preferred_element_type=jnp.float32)
    h = jax.nn.gelu(h + b1_ref[...].astype(jnp.float32), approximate=False)
    y = jnp.dot(h.astype(x.dtype), w2_ref[...],
                preferred_element_type=jnp.float32)
    y = y + b2_ref[...].astype(jnp.float32) + x.astype(jnp.float32)
    mu = jnp.mean(y, axis=-1, keepdims=True)
    var = jnp.mean(jnp.square(y - mu), axis=-1, keepdims=True)
    yn = (y - mu) * jax.lax.rsqrt(var + LN_EPS)
    o_ref[...] = (yn * g_ref[...].astype(jnp.float32)
                  + beta_ref[...].astype(jnp.float32)).astype(o_ref.dtype)


def ffn_add_layernorm(x2d, w1, b1, w2, b2, gamma, beta):
    M, D = x2d.shape
    F = w1.shape[1]
    tm = _tile(M, TM)
    return pl.pallas_call(
        _ffn_add_ln_kernel,
        out_shape=jax.ShapeDtypeStruct((M, D), x2d.dtype),
        grid=(M // tm,),
        in_specs=[
            pl.BlockSpec((tm, D), lambda i: (i, 0)),
            pl.BlockSpec((D, F), lambda i: (0, 0)),
            pl.BlockSpec((1, F), lambda i: (0, 0)),
            pl.BlockSpec((F, D), lambda i: (0, 0)),
            pl.BlockSpec((1, D), lambda i: (0, 0)),
            pl.BlockSpec((1, D), lambda i: (0, 0)),
            pl.BlockSpec((1, D), lambda i: (0, 0)),
        ],
        out_specs=pl.BlockSpec((tm, D), lambda i: (i, 0)),
        compiler_params=pltpu.CompilerParams(
            dimension_semantics=("parallel",), vmem_limit_bytes=VMEM_LIMIT),
    )(x2d, w1, b1.reshape(1, F), w2, b2.reshape(1, D),
      gamma.reshape(1, D), beta.reshape(1, D))


# --------------------------- parameters & forward --------------------------- #

def init_params(key, n_vocab, n_tokens, dim_embed, n_layers, dim_ff):
    n_keys = 1 + n_layers * 6
    keys = iter(jax.random.split(key, n_keys))

    def lin(k, fan_in, fan_out):
        kw, kb = jax.random.split(k)
        bound = 1.0 / math.sqrt(fan_in)      # torch.nn.Linear default init range
        w = jax.random.uniform(kw, (fan_in, fan_out), jnp.float32, -bound, bound)
        b = jax.random.uniform(kb, (fan_out,), jnp.float32, -bound, bound)
        return w.astype(PARAM_DTYPE), b.astype(PARAM_DTYPE)

    params = {
        "embed": jax.random.normal(next(keys), (n_vocab, dim_embed),
                                   jnp.float32).astype(PARAM_DTYPE),
        "pos": jnp.zeros((1, n_tokens, dim_embed), PARAM_DTYPE),  # torch init: zeros
        "layers": [],
    }
    for _ in range(n_layers):
        lp = {}
        wq, bq = lin(next(keys), dim_embed, dim_embed)
        wk, bk = lin(next(keys), dim_embed, dim_embed)
        wv, bv = lin(next(keys), dim_embed, dim_embed)
        # Fused QKV weight: one (D, 3D) matmul instead of three (D, D) ones.
        lp["wqkv"] = jnp.concatenate([wq, wk, wv], axis=1)
        lp["bqkv"] = jnp.concatenate([bq, bk, bv], axis=0)
        lp["wo"], lp["bo"] = lin(next(keys), dim_embed, dim_embed)
        lp["w1"], lp["b1"] = lin(next(keys), dim_embed, dim_ff)
        lp["w2"], lp["b2"] = lin(next(keys), dim_ff, dim_embed)
        lp["ln1_g"] = jnp.ones((dim_embed,), PARAM_DTYPE)
        lp["ln1_b"] = jnp.zeros((dim_embed,), PARAM_DTYPE)
        lp["ln2_g"] = jnp.ones((dim_embed,), PARAM_DTYPE)
        lp["ln2_b"] = jnp.zeros((dim_embed,), PARAM_DTYPE)
        params["layers"].append(lp)
    return params


def gpt1_core_forward(params, tokens, input_mask, n_heads):
    """tokens: (B, T) int32, input_mask: (B, T) bool -> (B, T, dim_embed)."""
    B, T = tokens.shape
    D = params["embed"].shape[1]
    d = D // n_heads
    scale = 1.0 / math.sqrt(d)

    # Embedding + positional parameter (glue; dropout = identity).
    x = jnp.take(params["embed"], tokens, axis=0) + params["pos"]     # (B, T, D)

    # Only the (B, T) padding mask goes to the kernel; the causal part is built
    # in-kernel with iota (no (B, T, T) mask materialized in HBM).
    mask_b1t = input_mask.astype(jnp.int32).reshape(B, 1, T)

    x2 = x.reshape(B * T, D)                                          # lane-dense slab
    for lp in params["layers"]:
        # --- MultiHeadedAttentionFast (fused QKV + in-kernel heads) ---
        qkv = linear(x2, lp["wqkv"], lp["bqkv"])                      # (B*T, 3D)
        att = multi_head_attention(qkv.reshape(B, T, 3 * D), mask_b1t,
                                   n_heads, d, scale)                 # (B, T, D)

        # --- W_out + SkipNorm(mha) fused (dropout = identity) ---
        y2 = proj_add_layernorm(att.reshape(B * T, D), lp["wo"], lp["bo"],
                                x2, lp["ln1_g"], lp["ln1_b"])         # (B*T, D)

        # --- FeedForward + SkipNorm(ff) fused (hidden stays in VMEM) ---
        x2 = ffn_add_layernorm(y2, lp["w1"], lp["b1"], lp["w2"], lp["b2"],
                               lp["ln2_g"], lp["ln2_b"])              # (B*T, D)

    return x2.reshape(B, T, D)


if __name__ == "__main__":
    # Small, forward-consistent shapes: batch=2, seq(n_tokens)=8, dim_embed=32,
    # n_heads=4 (head dim 8), n_decoder_layers=2, ff hidden=128, vocab=50.
    B, T, D, H, L = 2, 8, 32, 4, 2
    N_VOCAB = 50
    DIM_FF = 4 * D

    key = jax.random.PRNGKey(0)
    kp, kt = jax.random.split(key, 2)
    params = init_params(kp, N_VOCAB, T, D, L, DIM_FF)

    tokens = jax.random.randint(kt, (B, T), 0, N_VOCAB, dtype=jnp.int32)
    lengths = jnp.array([T, T - 3])
    input_mask = jnp.arange(T)[None, :] < lengths[:, None]   # (B, T) bool padding mask

    out = gpt1_core_forward(params, tokens, input_mask, H)
    out = jax.block_until_ready(out)
    assert out.shape == (B, T, D), out.shape
    assert out.dtype == PARAM_DTYPE, out.dtype
    print("KERNEL_OK")
</pallas_src>

<mosaic_0001>
module attributes {stable_mosaic.version = 11 : i64} {
  func.func @_linear_bias_kernel(%arg0: i32, %arg1: i32, %arg2: i32, %arg3: memref<16x32xbf16, #tpu.memory_space<vmem>>, %arg4: memref<32x96xbf16, #tpu.memory_space<vmem>>, %arg5: memref<1x96xbf16, #tpu.memory_space<vmem>>, %arg6: memref<16x96xbf16, #tpu.memory_space<vmem>>, %arg7: memref<16x96xf32, #tpu.memory_space<vmem>>) attributes {dimension_semantics = [#tpu.dimension_semantics<parallel>, #tpu.dimension_semantics<parallel>, #tpu.dimension_semantics<arbitrary>], iteration_bounds = array<i64: 1, 1, 1>, scalar_prefetch = 0 : i64, scratch_operands = 1 : i64, tpu.core_type = #tpu.core_type<tc>, window_params = [{transform_indices = @transform_0, window_bounds = array<i64: 16, 32>}, {transform_indices = @transform_1, window_bounds = array<i64: 32, 96>}, {transform_indices = @transform_2, window_bounds = array<i64: 1, 96>}, {transform_indices = @transform_3, window_bounds = array<i64: 16, 96>}]} {
    %c0_i32 = arith.constant 0 : i32
    %0 = arith.cmpi eq, %arg2, %c0_i32 : i32
    %1 = arith.extui %0 : i1 to i32
    %c0_i32_0 = arith.constant 0 : i32
    %2 = arith.cmpi ne, %1, %c0_i32_0 : i32
    scf.if %2 {
      %cst_10 = arith.constant 0.000000e+00 : f32
      %12 = vector.broadcast %cst_10 : f32 to vector<16x96xf32>
      %c0_11 = arith.constant 0 : index
      %c0_12 = arith.constant 0 : index
      %13 = vector.load %arg7[%c0_11, %c0_12] : memref<16x96xf32, #tpu.memory_space<vmem>>, vector<16x96xf32>
      tpu.vector_store %arg7[%c0_11, %c0_12], %12 {strides = array<i32>} : memref<16x96xf32, #tpu.memory_space<vmem>>, vector<16x96xf32>,
    } else {
    }
    %c0 = arith.constant 0 : index
    %c0_1 = arith.constant 0 : index
    %3 = vector.load %arg7[%c0, %c0_1] : memref<16x96xf32, #tpu.memory_space<vmem>>, vector<16x96xf32>
    %c0_2 = arith.constant 0 : index
    %c0_3 = arith.constant 0 : index
    %4 = vector.load %arg3[%c0_2, %c0_3] : memref<16x32xbf16, #tpu.memory_space<vmem>>, vector<16x32xbf16>
    %c0_4 = arith.constant 0 : index
    %c0_5 = arith.constant 0 : index
    %5 = vector.load %arg4[%c0_4, %c0_5] : memref<32x96xbf16, #tpu.memory_space<vmem>>, vector<32x96xbf16>
    %cst = arith.constant dense<0.000000e+00> : vector<16x96xf32>
    %6 = tpu.matmul %4, %5, %cst {dimension_numbers = #tpu.dot_dimension_numbers<[1], [0], [0], [1], [0, 0, 1, 1], [], []>} : vector<16x32xbf16>, vector<32x96xbf16>, vector<16x96xf32> -> vector<16x96xf32>
    %7 = arith.addf %3, %6 : vector<16x96xf32>
    %c0_6 = arith.constant 0 : index
    %c0_7 = arith.constant 0 : index
    %8 = vector.load %arg7[%c0_6, %c0_7] : memref<16x96xf32, #tpu.memory_space<vmem>>, vector<16x96xf32>
    tpu.vector_store %arg7[%c0_6, %c0_7], %7 {strides = array<i32>} : memref<16x96xf32, #tpu.memory_space<vmem>>, vector<16x96xf32>,
    %c0_i32_8 = arith.constant 0 : i32
    %9 = arith.cmpi eq, %arg2, %c0_i32_8 : i32
    %10 = arith.extui %9 : i1 to i32
    %c0_i32_9 = arith.constant 0 : i32
    %11 = arith.cmpi ne, %10, %c0_i32_9 : i32
    scf.if %11 {
      %c0_10 = arith.constant 0 : index
      %c0_11 = arith.constant 0 : index
      %12 = vector.load %arg7[%c0_10, %c0_11] : memref<16x96xf32, #tpu.memory_space<vmem>>, vector<16x96xf32>
      %c0_12 = arith.constant 0 : index
      %c0_13 = arith.constant 0 : index
      %13 = vector.load %arg5[%c0_12, %c0_13] : memref<1x96xbf16, #tpu.memory_space<vmem>>, vector<1x96xbf16>
      %14 = arith.extf %13 : vector<1x96xbf16> to vector<1x96xf32>
      %15 = vector.broadcast %14 : vector<1x96xf32> to vector<16x96xf32>
      %16 = arith.addf %12, %15 : vector<16x96xf32>
      %17 = arith.truncf %16 : vector<16x96xf32> to vector<16x96xbf16>
      %c0_14 = arith.constant 0 : index
      %c0_15 = arith.constant 0 : index
      %18 = vector.load %arg6[%c0_14, %c0_15] : memref<16x96xbf16, #tpu.memory_space<vmem>>, vector<16x96xbf16>
      tpu.vector_store %arg6[%c0_14, %c0_15], %17 {strides = array<i32>} : memref<16x96xbf16, #tpu.memory_space<vmem>>, vector<16x96xbf16>,
    } else {
    }
    return
  }
  func.func @transform_0(%arg0: i32, %arg1: i32, %arg2: i32) -> (i32, i32) {
    %c0_i32 = arith.constant 0 : i32
    return %arg0, %arg2 : i32, i32
  }
  func.func @transform_1(%arg0: i32, %arg1: i32, %arg2: i32) -> (i32, i32) {
    %c0_i32 = arith.constant 0 : i32
    return %arg2, %arg1 : i32, i32
  }
  func.func @transform_2(%arg0: i32, %arg1: i32, %arg2: i32) -> (i32, i32) {
    %c0_i32 = arith.constant 0 : i32
    %c0_i32_0 = arith.constant 0 : i32
    return %c0_i32, %arg1 : i32, i32
  }
  func.func @transform_3(%arg0: i32, %arg1: i32, %arg2: i32) -> (i32, i32) {
    %c0_i32 = arith.constant 0 : i32
    return %arg0, %arg1 : i32, i32
  }
}

</mosaic_0001>

<bundles_post_ra>
// kernel: tpu_custom_call.1
= control target key start
LH: loop header
LB: loop body
LE: loop exit
PB: predicated region body
PF: predicated region fallthrough
CT: control target
= control target key end

     0   :  { %8 = vsyncpa [#allocation4], 0  ;;  %s289_s0 = inlined_call_operand.hbm [shape: bf16[16,32], index: 0, kind: input, shape index: {}]   ;;  %s290_s1 = inlined_call_operand.hbm [shape: bf16[32,96], index: 1, kind: input, shape index: {}]   ;;  %s291_s2 = inlined_call_operand.vmem [shape: bf16[1,96], index: 2, kind: input, shape index: {}]   ;;  %s292_s3 = inlined_call_operand.hbm [shape: bf16[16,96], index: 3, kind: output, shape index: {}]  }
   0x1   :  { %9 = vsyncpa [#allocation7], 0 }
   0x2   :  { %10 = vsyncpa [#allocation5], 0  ;;  %s15_s14 = sshll.u32 %s289_s0, 4  ;;  %s238_s15 = smov [#allocation3]   ;;  %s16_s14 = int_to_ptr.hbm [resolvable:$true] %s15_s14 }
   0x3   :  { %s17_s16 = sshll.u32 %s238_s15, 4  ;;  %s28_s19 = sshll.u32 %s290_s1, 4  ;;  %s18_s16 = int_to_ptr.vmem [resolvable:$true] %s17_s16  ;;  %s29_s19 = int_to_ptr.hbm [resolvable:$true] %s28_s19 }
   0x4   :  { %s239_s20 = smov 64   ;;  %s240_s21 = smov 4  }
   0x5   :  { %23 = dma.hbm_to_vmem [thread:$0]  %s16_s14, 128, %s18_s16, [#allocation4], %s239_s20, %s239_s20, %s240_s21  }
   0x6   :  { %s241_s22 = smov [#allocation6]  }
   0x7   :  { %s30_s23 = sshll.u32 %s241_s22, 4  ;;  %s31_s23 = int_to_ptr.vmem [resolvable:$true] %s30_s23 }
   0x8   :  { %36 = dma.hbm_to_vmem [thread:$0]  %s29_s19, 256, %s31_s23, [#allocation7], %s239_s20, %s239_s20, %s240_s21  }
   0x9   :  { %232 = dma.done.wait [#allocation4], 128  }
   0xa   :  { %233 = vsyncadd [#allocation4], 4294967168 }
   0xb   :  { %234 = dma.done.wait [#allocation7], 256  }
   0xc   :  { %235 = vsyncadd [#allocation7], 4294967040  ;;  %vm52_vm0 = vcmask 785408   ;;  %v242_v0 = vmov 0.0   ;;  %v153_v1 = vld [vmem:[#allocation6 + $0x8] sm:$0xff]  ;;  %v152_v2 = vld [vmem:[#allocation6] sm:$0xff] }
   0xd   :  { %53 = vst.msk [vmem:[#allocation2] sm:$0xff] %vm52_vm0, %v242_v0  ;;  %90 = vmatpush.bf16.msra.mxu0 %v153_v1  ;;  %v151_v3 = vld [vmem:[#allocation3] sm:$0xff]  ;;  %vm80_vm1 = vcmask 261120   ;;  %v108_v6 = vld [vmem:[%s291_s2] sm:$0x1]  ;;  %vm115_vm2 = vcmask 781312  }
   0xe   :  { %54 = vst.msk [vmem:[#allocation2 + $0x8] sm:$0xff] %vm52_vm0, %v242_v0  ;;  %v109_v8 = vunpack.c.l.bf16 %v108_v6  ;;  %s243_s24 = smov [#allocation8]   ;;  %s124_s27 = sshll.u32 %s292_s3, 4  ;;  %s125_s27 = int_to_ptr.hbm [resolvable:$true] %s124_s27 }
   0xf   :  { %s122_s25 = sshll.u32 %s243_s24, 4  ;;  %s123_s25 = int_to_ptr.vmem [resolvable:$true] %s122_s25 }
  0x10   :  { %v110_v10 = vperm.slane %v109_v8, 0 }
  0x11   :  { %91 = vmatpush.bf16.msra.mxu0 %v152_v2 }
  0x14   :  { %150 = vmatmul.msk.bf16.vlgmr.msra.gmra.mxu0 %vm80_vm1, %v151_v3  ;;  %v55_v4 = vld [vmem:[#allocation2] sm:$0xff] }
  0x15   :  { %v56_v9 = vld [vmem:[#allocation2 + $0x8] sm:$0xff] }
  0x91   :  { %v93_v5 = vpop.f32.mrf.mxu0 }
  0x92   :  { %v98_v7 = vadd.f32 %v93_v5, %v55_v4 }
  0x94   :  { %101 = vst.msk [vmem:[#allocation2] sm:$0xff] %vm52_vm0, %v98_v7 }
  0x99   :  { %v95_v11 = vpop.f32.mrf.mxu0 }
  0x9a   :  { %v99_v12 = vadd.f32 %v95_v11, %v56_v9 }
  0x9b   :  { %v106_v13 = vld [vmem:[#allocation2] sm:$0xff] }
  0x9c   :  { %102 = vst.msk [vmem:[#allocation2 + $0x8] sm:$0xff] %vm52_vm0, %v99_v12  ;;  %v111_v14 = vadd.f32 %v110_v10, %v106_v13 }
  0x9e   :  { %v113_v15 = vpack.c.bf16 %v111_v14, %v111_v14 }
  0xa0   :  { %116 = vst.msk [vmem:[#allocation8] sm:$0xf] %vm115_vm2, %v113_v15 }
  0xa3   :  { %v107_v16 = vld [vmem:[#allocation2 + $0x8] sm:$0xff] }
  0xa4   :  { %v112_v17 = vadd.f32 %v110_v10, %v107_v16 }
  0xa6   :  { %v114_v18 = vpack.c.bf16 %v112_v17, %v112_v17 }
  0xa8   :  { %117 = vst.msk [vmem:[#allocation8 + $0x4] sm:$0xf] %vm115_vm2, %v114_v18 }
  0xa9   :  { %130 = dma.vmem_to_hbm [thread:$0]  %s123_s25, 128, %s125_s27, [#allocation5], %s239_s20, %s239_s20, %s240_s21  }
  0xaa   :  { %236 = dma.done.wait [#allocation5], 128  }
  0xab   :  { %237 = vsyncadd [#allocation5], 4294967168 }
  0xac   :  { %135 = vsyncpa [#allocation4], 1 }
  0xad   :  { %136 = vsyncpa [#allocation7], 1 }
  0xae   :  { %137 = vsyncpa [#allocation5], 1 }

</bundles_post_ra>
